<compile_context>
chip_gen: v7x
topology: tpu7x:2x2x1
jax: 0.10.0
libtpu: 0.0.40
codegen_flags: <defaults>
</compile_context>

<pallas_src>
import jax
import jax.numpy as jnp
from jax.experimental import pallas as pl
from jax.experimental.pallas import tpu as pltpu


def _row_stats_kernel(x_ref, logz_ref, sumx_ref):
    """Per-row softmax statistics for one batch tile: log_z and sum(x)."""
    x = x_ref[...]                                             # (TB, C), native dtype
    # Numerically stable log-partition per row; max stays in native dtype.
    m = jnp.max(x, axis=-1, keepdims=True).astype(jnp.float32)  # (TB, 1)
    e = jnp.exp(x.astype(jnp.float32) - m)                      # EUP, (TB, C) f32
    sum_exp = jnp.sum(e, axis=-1, keepdims=True)                # (TB, 1)
    logz_ref[...] = m + jnp.log(sum_exp)

    if jnp.dtype(x.dtype).itemsize < 4:
        # bf16/f16: exact f32-accumulated row sum on the idle MXU
        # (frees the VALU slot, which otherwise ties with the EUP exp).
        ones = jnp.ones((x.shape[-1], 1), dtype=x.dtype)
        sumx_ref[...] = jnp.dot(x, ones, preferred_element_type=jnp.float32)
    else:
        # f32 inputs: keep the sum on the VPU (default-precision f32 matmul
        # would truncate operands to bf16).
        sumx_ref[...] = jnp.sum(x, axis=-1, keepdims=True, dtype=jnp.float32)


def smoothed_cross_entropy_loss(logits, labels, smoothing=0.0, *, tile_b=None):
    """logits: (B, C) float (f32/bf16); labels: (B,) int. Returns scalar f32."""
    B, C = logits.shape
    itemsize = jnp.dtype(logits.dtype).itemsize

    try:
        vmem_cap = int(pltpu.get_tpu_info().vmem_capacity_bytes)
    except Exception:
        vmem_cap = 64 * 1024 * 1024   # v7x per-TensorCore floor; v5e/v6e have 128 MiB

    if tile_b is None:
        # Working set per batch tile:
        #   2 x native logits block (double-buffered input pipeline)
        # + ~3 x f32 tile-sized temporaries (upcast / (x - m) / exp result).
        bytes_per_row = C * (2 * itemsize + 3 * 4)
        tb = int(vmem_cap * 0.5) // max(1, bytes_per_row)
        tb = max(8, (tb // 8) * 8)
        tb = min(tb, 4096)
        if B >= 16:
            # Keep at least two tiles so the "parallel" grid axis can use both
            # v7x TensorCores and the pipeline has something to overlap.
            half = -(-B // 2)
            half = -(-half // 8) * 8
            tb = min(tb, half)
        tile_b = tb
    if tile_b >= B:
        # Single full block: block dims == array dims, so no (8, 128)
        # divisibility constraint and no ragged tail.
        tile_b = B
    else:
        tile_b = max(8, ((tile_b + 7) // 8) * 8)   # second-minor dim: multiple of 8

    num_tiles = pl.cdiv(B, tile_b)

    cost = pl.CostEstimate(
        flops=8 * B * C,
        transcendentals=B * C,
        bytes_accessed=B * C * itemsize + 2 * B * 4,
    )

    log_z, sum_x = pl.pallas_call(
        _row_stats_kernel,
        out_shape=(jax.ShapeDtypeStruct((B, 1), jnp.float32),
                   jax.ShapeDtypeStruct((B, 1), jnp.float32)),
        grid_spec=pltpu.PrefetchScalarGridSpec(
            num_scalar_prefetch=0,
            grid=(num_tiles,),
            in_specs=[pl.BlockSpec((tile_b, C), lambda i: (i, 0))],
            out_specs=(pl.BlockSpec((tile_b, 1), lambda i: (i, 0)),
                       pl.BlockSpec((tile_b, 1), lambda i: (i, 0))),
        ),
        compiler_params=pltpu.CompilerParams(
            dimension_semantics=("parallel",),                       # megacore-safe
            vmem_limit_bytes=min(int(vmem_cap * 0.85), 112 * 1024 * 1024),
        ),
        cost_estimate=cost,
    )(logits)

    # Label gather done wrapper-side: a B-element HBM gather, negligible traffic.
    labels2d = labels.astype(jnp.int32).reshape(B, 1)
    x_label = jnp.take_along_axis(logits, labels2d, axis=-1).astype(jnp.float32)

    loss = x_label - log_z                     # log_prob at the label, (B, 1)
    sum_probs = sum_x - float(C) * log_z       # sum(log_probs, -1),    (B, 1)

    n = C - 1.0
    p = 1.0 - smoothing
    q = (smoothing / n) if n > 0 else 0.0      # C == 1 is degenerate (same as ref)
    val = p * loss + q * (sum_probs - loss)
    return -jnp.sum(val)


def _reference(logits, labels, smoothing=0.0):
    log_probs = jax.nn.log_softmax(logits.astype(jnp.float32), axis=-1)
    loss = log_probs[jnp.arange(labels.shape[0]), labels]
    n = logits.shape[-1] - 1.0
    p = 1.0 - smoothing
    q = smoothing / n
    sum_probs = jnp.sum(log_probs, axis=-1)
    loss = p * loss + q * (sum_probs - loss)
    return -loss.sum()


if __name__ == "__main__":
    key = jax.random.PRNGKey(0)

    # Case 1: f32, auto tiling (B >= 16 -> two tiles over the parallel grid axis).
    k1, k2, key = jax.random.split(key, 3)
    B, C, s = 16, 32, 0.1
    logits = jax.random.normal(k1, (B, C), dtype=jnp.float32)
    labels = jax.random.randint(k2, (B,), 0, C, dtype=jnp.int32)
    out = jax.block_until_ready(smoothed_cross_entropy_loss(logits, labels, s))
    ref = _reference(logits, labels, s)
    assert jnp.allclose(out, ref, rtol=1e-5, atol=1e-4), (out, ref)

    # Case 2: ragged batch, explicit small tile (multi-tile + clipped last block).
    k1, k2, key = jax.random.split(key, 3)
    B, C, s = 20, 48, 0.2
    logits = jax.random.normal(k1, (B, C), dtype=jnp.float32)
    labels = jax.random.randint(k2, (B,), 0, C, dtype=jnp.int32)
    out = jax.block_until_ready(
        smoothed_cross_entropy_loss(logits, labels, s, tile_b=8))
    ref = _reference(logits, labels, s)
    assert jnp.allclose(out, ref, rtol=1e-5, atol=1e-4), (out, ref)
    # Same inputs, auto tiling (tile_b=16 -> ragged final block via writeback clip).
    out = jax.block_until_ready(smoothed_cross_entropy_loss(logits, labels, s))
    assert jnp.allclose(out, ref, rtol=1e-5, atol=1e-4), (out, ref)

    # Case 3: bf16 logits stay bf16 in HBM; sum_x takes the MXU path.
    k1, k2, key = jax.random.split(key, 3)
    B, C, s = 16, 32, 0.1
    logits = jax.random.normal(k1, (B, C), dtype=jnp.bfloat16)
    labels = jax.random.randint(k2, (B,), 0, C, dtype=jnp.int32)
    out = jax.block_until_ready(smoothed_cross_entropy_loss(logits, labels, s))
    ref = _reference(logits, labels, s)
    assert jnp.allclose(out, ref, rtol=2e-5, atol=1e-3), (out, ref)

    print("KERNEL_OK")
</pallas_src>

<mosaic_0001>
module attributes {stable_mosaic.version = 11 : i64} {
  func.func @_row_stats_kernel(%arg0: i32, %arg1: memref<8x32xf32, #tpu.memory_space<vmem>>, %arg2: memref<8x1xf32, #tpu.memory_space<vmem>>, %arg3: memref<8x1xf32, #tpu.memory_space<vmem>>) attributes {dimension_semantics = [#tpu.dimension_semantics<parallel>], iteration_bounds = array<i64: 2>, scalar_prefetch = 0 : i64, scratch_operands = 0 : i64, tpu.core_type = #tpu.core_type<tc>, window_params = [{transform_indices = @transform_0, window_bounds = array<i64: 8, 32>}, {transform_indices = @transform_1, window_bounds = array<i64: 8, 1>}, {transform_indices = @transform_2, window_bounds = array<i64: 8, 1>}]} {
    %c0 = arith.constant 0 : index
    %c0_0 = arith.constant 0 : index
    %0 = vector.load %arg1[%c0, %c0_0] : memref<8x32xf32, #tpu.memory_space<vmem>>, vector<8x32xf32>
    %cst = arith.constant dense<0xFF800000> : vector<8xf32>
    %1 = vector.multi_reduction <maximumf>, %0, %cst [1] : vector<8x32xf32> to vector<8xf32>
    %2 = vector.shape_cast %1 : vector<8xf32> to vector<8x1xf32>
    %3 = vector.broadcast %2 : vector<8x1xf32> to vector<8x32xf32>
    %4 = arith.subf %0, %3 : vector<8x32xf32>
    %5 = math.exp %4 : vector<8x32xf32>
    %cst_1 = arith.constant dense<0.000000e+00> : vector<8xf32>
    %6 = vector.multi_reduction <add>, %5, %cst_1 [1] : vector<8x32xf32> to vector<8xf32>
    %7 = vector.shape_cast %6 : vector<8xf32> to vector<8x1xf32>
    %8 = math.log %7 : vector<8x1xf32>
    %9 = arith.addf %2, %8 : vector<8x1xf32>
    %c0_2 = arith.constant 0 : index
    %c0_3 = arith.constant 0 : index
    %10 = vector.load %arg2[%c0_2, %c0_3] : memref<8x1xf32, #tpu.memory_space<vmem>>, vector<8x1xf32>
    tpu.vector_store %arg2[%c0_2, %c0_3], %9 {strides = array<i32>} : memref<8x1xf32, #tpu.memory_space<vmem>>, vector<8x1xf32>,
    %cst_4 = arith.constant dense<0.000000e+00> : vector<8xf32>
    %11 = vector.multi_reduction <add>, %0, %cst_4 [1] : vector<8x32xf32> to vector<8xf32>
    %12 = vector.shape_cast %11 : vector<8xf32> to vector<8x1xf32>
    %c0_5 = arith.constant 0 : index
    %c0_6 = arith.constant 0 : index
    %13 = vector.load %arg3[%c0_5, %c0_6] : memref<8x1xf32, #tpu.memory_space<vmem>>, vector<8x1xf32>
    tpu.vector_store %arg3[%c0_5, %c0_6], %12 {strides = array<i32>} : memref<8x1xf32, #tpu.memory_space<vmem>>, vector<8x1xf32>,
    return
  }
  func.func @transform_0(%arg0: i32) -> (i32, i32) {
    %c0_i32 = arith.constant 0 : i32
    %c0_i32_0 = arith.constant 0 : i32
    return %arg0, %c0_i32 : i32, i32
  }
  func.func @transform_1(%arg0: i32) -> (i32, i32) {
    %c0_i32 = arith.constant 0 : i32
    %c0_i32_0 = arith.constant 0 : i32
    return %arg0, %c0_i32 : i32, i32
  }
  func.func @transform_2(%arg0: i32) -> (i32, i32) {
    %c0_i32 = arith.constant 0 : i32
    %c0_i32_0 = arith.constant 0 : i32
    return %arg0, %c0_i32 : i32, i32
  }
}

</mosaic_0001>

<bundles_post_ra>
// kernel: tpu_custom_call.1
= control target key start
LH: loop header
LB: loop body
LE: loop exit
PB: predicated region body
PF: predicated region fallthrough
CT: control target
= control target key end

     0   :  { %8 = vsyncpa [#allocation3], 0  ;;  %s532_s0 = inlined_call_operand.hbm [shape: f32[16,32], index: 0, kind: input, shape index: {}]   ;;  %s533_s1 = inlined_call_operand.vmem [shape: f32[16,1], index: 1, kind: output, shape index: {0}]   ;;  %s534_s2 = inlined_call_operand.vmem [shape: f32[16,1], index: 2, kind: output, shape index: {1}]  }
   0x1   :  { %10 = vsyncpa [#allocation3 + $0x1], 0  ;;  %s422_s9 = smov 0   ;;  %s424_s10 = smov 0  }
   0x2   :  { %s426_s11 = smov 0   ;;  %s428_s12 = smov 0  }
   0x3 LB: > { %s441_s13 = sadd.s32 4294967295, %s404_s12   ;;  %s444_s14 = sadd.s32 1, %s404_s12   ;;  %s404_s12 = sphi %s428_s12, %s542_s12   ;;  %s400_s11 = sphi %s426_s11, %s541_s11   ;;  %s396_s10 = sphi %s424_s10, %s540_s10   ;;  %s392_s9 = sphi %s422_s9, %s539_s9  }
   0x4   : > { %s20_s15 = ssub.s32 %s404_s12, %s444_s14  ;;  %s23_s16 = sadd.s32 1, %s400_s11 }
   0x5   : > { %p21_p0 = scmp.eq.s32.totalorder %s20_s15, 0  ;;  %p30_p1 = scmp.ne.s32.totalorder %s400_s11, %s396_s10 }
   0x6   : > { %p31_p2 = scmp.eq.s32.totalorder %s404_s12, 0  ;;  %p36_p3 = scmp.ne.s32.totalorder %s396_s10, %s392_s9 }
   0x7   : > { %s454_s17 = scalar_select %p21_p0, %s400_s11, %s23_s16  }
   0x8   : > { %p32_p4 = por %p31_p2, %p30_p1  ;;  %p37_p5 = scmp.eq.s32.totalorder %s441_s13, 0 }
   0x9   : > { %p303_p6 = scmp.lt.s32.totalorder %s404_s12, 2  ;;  %s112_s19 = sand.u32 1, %s400_s11  }
   0xa   : > { %p458_p7 = por %p37_p5, %p36_p3  ;;  %s289_s20 = sshll.u32 %s112_s19, 3 }
   0xb   : > { %s290_s21 = sshll.u32 %s404_s12, 7  ;;  %s116_s25 = scalar_lea.vmem [#allocation2], %s289_s20 }
   0xc   : > { %s467_s24 = scalar_lea.hbm %s532_s0, %s290_s21  ;;  %s123_s26 = sshll.u32 %s116_s25, 4  ;;  %s469_s26 = int_to_ptr.vmem [resolvable:$true] %s123_s26 }
   0xd   : > { %p471_p8 = pnand %p303_p6, %p32_p4  ;;  %s113_s28 = scalar_lea.sflag [#allocation3], %s112_s19 }
   0xe   : > { %s340_s29 = scalar_lea.hbm %s467_s24, 128  ;;  %s345_s4 = scalar_lea.hbm %s532_s0, 256 }
   0xf   : > { %p341_p11 = scmp.ne.s32.totalorder %s467_s24, %s340_s29  ;;  %p342_p12 = pneg %p471_p8 }
  0x10   : > { %p346_p1 = scmp.lt.u32.totalorder %s467_s24, %s532_s0  ;;  %p347_p2 = scmp.lt.u32.totalorder %s345_s4, %s340_s29 }
  0x11   : > { %p343_p13 = pnand %p342_p12, %p341_p11  ;;  %p349_p4 = scmp.lt.u32.totalorder %s340_s29, %s467_s24 }
  0x12   : > { %p348_p3 = por %p347_p2, %p346_p1 }
  0x13   : > { %p344_p0 = pneg %p343_p13 }
  0x14   : > { %p350_p5 = por %p349_p4, %p348_p3 }
  0x16   : > { %p351_p6 = pnand %p350_p5, %p344_p0 }
  0x18   : > { %354 = shalt.err (!%p351_p6)
}
  0x19   : > { %s355_s7 = scalar_lea.vmem %s469_s26, 128  ;;  %s406_s8 = smov [#allocation2]  }
  0x1a   : > { %p356_p11 = scmp.ne.s32.totalorder %s469_s26, %s355_s7  ;;  %s360_s9 = sshll.u32 %s406_s8, 4  ;;  %s361_s9 = int_to_ptr.vmem [resolvable:$false] %s360_s9 }
  0x1b   : > { %s362_s15 = scalar_lea.vmem %s361_s9, 256  ;;  %p363_p10 = scmp.lt.s32.totalorder %s469_s26, %s361_s9 }
  0x1c   : > { %p358_p13 = pnand %p356_p11, %p342_p12  ;;  %p364_p1 = scmp.lt.s32.totalorder %s362_s15, %s355_s7 }
  0x1e   : > { %p359_p9 = pneg %p358_p13  ;;  %p365_p2 = por %p364_p1, %p363_p10 }
  0x20   : > { %p366_p3 = pnand %p365_p2, %p359_p9 }
  0x22   : > { %369 = shalt.err (!%p366_p3)
}
  0x23   : > { %302 = dma.hbm_to_vmem [thread:$0]  (!%p471_p8), %s467_s24, 128, %s469_s26, %s113_s28  }
  0x24   : > { %p537_p0 = scmp.lt.s32.totalorder %s404_s12, 3  ;;  %p538_p4 = scmp.ge.s32.totalorder %s404_s12, 1 }
  0x26   : > { %p129_p12 = pnand %p538_p4, %p537_p0 }
  0x27   : > { %s134_s16 = sand.u32 (!%p129_p12), 1, %s396_s10  }
  0x28   : > { %132 = sbr.rel (%p129_p12) target bundleno = 366 (0x16e), region = 24  ;;  %s292_s19 = sshll.u32 (!%p129_p12), %s134_s16, 3 }
  0x29   : > { %s135_s20 = scalar_lea.sflag (!%p129_p12), [#allocation3], %s134_s16  ;;  %s138_s21 = scalar_lea.vmem (!%p129_p12), [#allocation2], %s292_s19 }
  0x2f   : > { %387 = dma.done.wait (%p458_p7), %s135_s20, 128  }
  0x30   : > { %389 = vsyncadd (%p458_p7), %s135_s20, 4294967168  ;;  %vm171_vm0 = vcmask 261120   ;;  %v170_v0 = vld [vmem:[%s138_s21] sm:$0xff]  ;;  %p162_p8 = scmp.lt.s32.totalorder %s441_s13, 1  ;;  %vm184_vm1 = vcmask 7168  }
  0x31   : > { %v172_v1 = vsel %vm171_vm0, %v170_v0, -inf  ;;  %v186_v2 = vsel %vm171_vm0, %v170_v0, 0.0 }
  0x32   : > { %173 = vmax.xlane.f32.xlu0 %v172_v1  ;;  %187 = vadd.xlane.f32.xlu1 %v186_v2  ;;  %s544_s13 = smov (!%p162_p8, %s441_s13), 1 }
  0x33   : > { %s293_s12 = sshll.u32 %s544_s13, 3 }
  0x34   : > { %s169_s23 = scalar_lea.vmem %s534_s2, %s293_s12  ;;  %s165_s26 = scalar_lea.vmem %s533_s1, %s293_s12 }
  0xbf   : > { %v174_v3 = vpop.xlane.xlu0 %173  ;;  %v188_v8 = vpop.xlane.xlu1 %187 }
  0xc0   : > { %v175_v4 = vsub.f32 %v170_v0, %v174_v3  ;;  %189 = vst.msk [vmem:[%s169_s23] sm:$0xff] %vm184_vm1, %v188_v8 }
  0xc2   : > { %v176_v5 = vmul.f32 1.442695, %v175_v4 }
  0xc4   : > { %336 = vpow2.f32 %v176_v5 }
  0xce   : > { %v337_v6 = vpop.eup %336 }
  0xcf   : > { %v178_v7 = vsel %vm171_vm0, %v337_v6, 0.0 }
  0xd0   : > { %179 = vadd.xlane.f32.xlu0 %v178_v7 }
 0x15d   : > { %v180_v9 = vpop.xlane.xlu0 %179 }
 0x15e   : > { %338 = vlog2.f32 %v180_v9 }
 0x168   : > { %v339_v10 = vpop.eup %338 }
 0x169   : > { %v182_v11 = vmul.f32 0.6931472, %v339_v10 }
 0x16b   : > { %v183_v12 = vadd.f32 %v182_v11, %v174_v3 }
 0x16d   : > { %185 = vst.msk [vmem:[%s165_s26] sm:$0xff] %vm184_vm1, %v183_v12 }
 0x16e PF: > { %p13_p7 = scmp.ge.s32.totalorder %s444_s14, 4   ;;  %s539_s9 = smov %s396_s10 }
 0x16f   : > { %s540_s10 = smov %s400_s11  ;;  %s541_s11 = smov %s454_s17 }
 0x170   : > { %s542_s12 = smov %s444_s14  ;;  %15 = sbr.rel (!%p13_p7) target bundleno = 3 (0x3), region = 76 }
 0x177   :  { %223 = vsyncpa [#allocation3], 1 }
 0x178   :  { %225 = vsyncpa [#allocation3 + $0x1], 1 }

</bundles_post_ra>
